<compile_context>
chip_gen: v7x
topology: tpu7x:2x2x1
jax: 0.10.0
libtpu: 0.0.40
codegen_flags: <defaults>
</compile_context>

<pallas_src>
import functools
import math

import jax
import jax.numpy as jnp
from jax import lax
from jax.experimental import pallas as pl
from jax.experimental.pallas import tpu as pltpu

_LANES = 128
_SUBLANES = 8
_MAX_BLOCK_ROWS = 2048      # (2048, 128) f32 block = 1 MiB
_SMALL_MAX_ROWS = 1024      # single-block (no pipeline) path for inputs up to 1024x128
_SENTINEL = 1000.0          # |x| big enough that its BCE loss is exactly 0.0 in f32


def _cdiv(a, b):
    return -(-a // b)


def _round_up(a, b):
    return _cdiv(a, b) * b


@functools.lru_cache(maxsize=1)
def _num_tensorcores():
    """Best-effort TensorCores per device: 1 on v5e/v6e, 2 on v4/v5p/v7x."""
    try:
        dev = jax.devices()[0]
    except Exception:
        return 1
    if getattr(dev, "platform", "") != "tpu":
        return 1
    cores = getattr(dev, "num_cores", None)
    if isinstance(cores, int) and cores > 0:
        return max(1, min(cores, 2))
    kind = str(getattr(dev, "device_kind", "")).lower()
    if any(tag in kind for tag in ("v4", "v5p", "v5 p", "v7", "7x")):
        return 2
    return 1


def _stream_plan(rows, num_parts):
    """Pick (steps, block_rows, padded_rows): num_parts*steps blocks of
    (block_rows, 128) covering `rows`, preferring an exact factorization
    (zero padding, zero input copy)."""
    tb0 = max(num_parts, _cdiv(rows, _MAX_BLOCK_ROWS))
    total_blocks = None
    block_rows = None
    for tb in range(tb0, tb0 + 64):
        if tb % num_parts or rows % tb:
            continue
        br = rows // tb
        if br % _SUBLANES == 0 and br <= _MAX_BLOCK_ROWS:
            total_blocks, block_rows = tb, br
            break
    if total_blocks is None:
        total_blocks = _round_up(tb0, num_parts)
        block_rows = _round_up(_cdiv(rows, total_blocks), _SUBLANES)
    steps = total_blocks // num_parts
    return steps, block_rows, total_blocks * block_rows


def _to_slab(x, sentinel, rows):
    """(...) -> (rows, 128).  A free reshape when x.size == rows*128 (aligned,
    common case); otherwise the tail is padded with a sentinel whose BCE loss is
    exactly 0 for the corresponding label so the kernel stays mask-free."""
    flat = x.reshape(-1)
    pad = rows * _LANES - flat.shape[0]
    if pad:
        # TODO(synk): ragged sizes still pay one pad copy; avoiding it would need
        # relying on out-of-bounds boundary-block semantics (in-kernel tail mask).
        flat = jnp.concatenate([flat, jnp.full((pad,), sentinel, dtype=flat.dtype)])
    return flat.reshape(rows, _LANES)


def _bce_loss(x, target_one):
    # BCEWithLogitsLoss: max(x,0) - x*y + log1p(exp(-|x|)), y in {0,1} (static).
    stable = jnp.log1p(jnp.exp(-jnp.abs(x)))
    return stable + (jnp.maximum(-x, 0.0) if target_one else jnp.maximum(x, 0.0))


def _make_small_kernel(inv_n, targets):
    """Whole-array single-step kernel: per-input BCE sum, scaled, scalar out."""
    n_in = len(targets)

    def kernel(*refs):
        in_refs, o_ref = refs[:n_in], refs[n_in]
        total = jnp.float32(0.0)
        for x_ref, tgt in zip(in_refs, targets):
            x = x_ref[...].astype(jnp.float32)
            total = total + jnp.sum(_bce_loss(x, tgt))
        o_ref[...] = jnp.reshape(total * inv_n, (1, 1))

    return kernel


def _make_stream_kernel(block_rows, inv_n, targets):
    """Streaming reduction: fori_loop over (8,128) vreg tiles into an (8,128)
    accumulator; in-kernel cross-lane reduce + 1/n scale on the last step (one
    scalar written once per core partition)."""
    n_in = len(targets)
    assert block_rows % _SUBLANES == 0
    n_sub = block_rows // _SUBLANES

    def kernel(*refs):
        in_refs = refs[:n_in]
        o_ref = refs[n_in]
        acc_ref = refs[n_in + 1]
        step = pl.program_id(1)

        @pl.when(step == 0)
        def _init():
            acc_ref[...] = jnp.zeros_like(acc_ref)

        def body(j, acc):
            r = pl.multiple_of(j * _SUBLANES, _SUBLANES)
            for x_ref, tgt in zip(in_refs, targets):
                x = x_ref[pl.ds(r, _SUBLANES), :].astype(jnp.float32)
                acc = acc + _bce_loss(x, tgt)
            return acc

        acc_ref[...] += lax.fori_loop(
            0, n_sub, body,
            jnp.zeros((_SUBLANES, _LANES), jnp.float32), unroll=8)

        @pl.when(step == pl.num_programs(1) - 1)
        def _fin():
            o_ref[...] = jnp.reshape(jnp.sum(acc_ref[...]) * inv_n, (1, 1, 1))

    return kernel


def _mean_bce(xs, targets):
    """sum_i sum(BCE(xs[i], targets[i])) / n with n = element count of each x
    (all xs must have equal element counts)."""
    n = math.prod(xs[0].shape)
    assert all(math.prod(x.shape) == n for x in xs)
    rows = _cdiv(n, _LANES)
    n_cores = _num_tensorcores()
    inv_n = 1.0 / float(n)
    sentinels = [_SENTINEL if t else -_SENTINEL for t in targets]

    small_limit = max(_SUBLANES, _SMALL_MAX_ROWS // n_cores)
    if rows <= small_limit:
        slabs = [_to_slab(x, s, rows) for x, s in zip(xs, sentinels)]
        out = pl.pallas_call(
            _make_small_kernel(inv_n, targets),
            out_shape=jax.ShapeDtypeStruct((1, 1), jnp.float32),
            grid=(1,),
            in_specs=[pl.BlockSpec((rows, _LANES), lambda i: (0, 0)) for _ in xs],
            out_specs=pl.BlockSpec((1, 1), lambda i: (0, 0)),
        )(*slabs)
        return out[0, 0]

    num_parts = min(n_cores, 2)
    steps, block_rows, rows_pad = _stream_plan(rows, num_parts)
    slabs = [_to_slab(x, s, rows_pad) for x, s in zip(xs, sentinels)]
    in_map = lambda p, i: (p * steps + i, 0)
    partials = pl.pallas_call(
        _make_stream_kernel(block_rows, inv_n, targets),
        out_shape=jax.ShapeDtypeStruct((num_parts, 1, 1), jnp.float32),
        grid_spec=pltpu.PrefetchScalarGridSpec(
            num_scalar_prefetch=0,
            grid=(num_parts, steps),
            in_specs=[pl.BlockSpec((block_rows, _LANES), in_map) for _ in xs],
            out_specs=pl.BlockSpec((1, 1, 1), lambda p, i: (p, 0, 0)),
            scratch_shapes=[pltpu.VMEM((_SUBLANES, _LANES), jnp.float32)],
        ),
        compiler_params=pltpu.CompilerParams(
            dimension_semantics=("parallel", "arbitrary")),
    )(*slabs)
    return jnp.sum(partials)


def log_d_loss(*, fake_scores=None, real_scores=None):
    """JAX/Pallas equivalent of LogDloss.forward(**kwargs)."""
    if fake_scores is None:
        raise RuntimeError(
            "invalid arguments: expected {real_scores, fake_scores} or {fake_scores}")
    if real_scores is None:
        return _mean_bce((fake_scores,), (True,))
    if math.prod(real_scores.shape) == math.prod(fake_scores.shape):
        # fused critic pass: one pipeline streams both tensors
        return _mean_bce((real_scores, fake_scores), (True, False))
    # mismatched sizes: two passes instead of padding the smaller tensor
    return (_mean_bce((real_scores,), (True,))
            + _mean_bce((fake_scores,), (False,)))


def _reference(fake_scores, real_scores=None):
    """Pure-JAX reference for validation."""
    def bce_mean(x, y):
        x = x.astype(jnp.float32)
        return jnp.mean(jnp.maximum(x, 0.0) - x * y + jnp.log1p(jnp.exp(-jnp.abs(x))))
    if real_scores is not None:
        return bce_mean(real_scores, 1.0) + bce_mean(fake_scores, 0.0)
    return bce_mean(fake_scores, 1.0)


if __name__ == "__main__":
    key = jax.random.PRNGKey(0)

    cases = [
        # (fake_shape, real_shape) -- PatchGAN-like NCHW discriminator score maps.
        ((2, 4, 16, 16), (2, 4, 16, 16)),      # aligned -> zero-copy single-block path
        ((3, 1, 37, 53), (3, 1, 37, 53)),      # ragged -> minimal sentinel-pad path
        ((6, 8, 80, 100), (6, 8, 80, 100)),    # streaming path, exact factorization
        ((2, 4, 16, 16), (3, 1, 37, 53)),      # mismatched critic -> two passes
        ((2, 1, 550, 128), (2, 1, 550, 128)),  # streaming fallback (padded geometry)
    ]

    keys = iter(jax.random.split(key, 2 * len(cases)))
    for fshape, rshape in cases:
        fake = jax.random.normal(next(keys), fshape, dtype=jnp.float32)
        real = jax.random.normal(next(keys), rshape, dtype=jnp.float32)

        gen = jax.block_until_ready(log_d_loss(fake_scores=fake))
        crit = jax.block_until_ready(
            log_d_loss(fake_scores=fake, real_scores=real))

        gen_ref = _reference(fake)
        crit_ref = _reference(fake, real)
        assert jnp.allclose(gen, gen_ref, atol=1e-5, rtol=1e-5), (fshape, gen, gen_ref)
        assert jnp.allclose(crit, crit_ref, atol=1e-5, rtol=1e-5), (
            fshape, rshape, crit, crit_ref)

    print("KERNEL_OK")
</pallas_src>

<mosaic_0001>
module attributes {stable_mosaic.version = 11 : i64} {
  func.func @kernel(%arg0: i32, %arg1: memref<16x128xf32, #tpu.memory_space<vmem>>, %arg2: memref<1x1xf32, #tpu.memory_space<vmem>>) attributes {dimension_semantics = [#tpu.dimension_semantics<arbitrary>], iteration_bounds = array<i64: 1>, scalar_prefetch = 0 : i64, scratch_operands = 0 : i64, tpu.core_type = #tpu.core_type<tc>, window_params = [{pipeline_mode = #tpu.pipeline_mode<synchronous>, transform_indices = @transform_0, window_bounds = array<i64: 16, 128>}, {pipeline_mode = #tpu.pipeline_mode<synchronous>, transform_indices = @transform_1, window_bounds = array<i64: 1, 1>}]} {
    %c0 = arith.constant 0 : index
    %c0_0 = arith.constant 0 : index
    %0 = vector.load %arg1[%c0, %c0_0] : memref<16x128xf32, #tpu.memory_space<vmem>>, vector<16x128xf32>
    %1 = math.absf %0 : vector<16x128xf32>
    %cst = arith.constant 0.000000e+00 : f32
    %2 = vector.broadcast %cst : f32 to vector<16x128xf32>
    %3 = arith.subf %2, %1 : vector<16x128xf32>
    %4 = math.exp %3 : vector<16x128xf32>
    %5 = math.log1p %4 : vector<16x128xf32>
    %cst_1 = arith.constant 0.000000e+00 : f32
    %6 = vector.broadcast %cst_1 : f32 to vector<16x128xf32>
    %7 = arith.subf %6, %0 : vector<16x128xf32>
    %cst_2 = arith.constant 0.000000e+00 : f32
    %8 = vector.broadcast %cst_2 : f32 to vector<16x128xf32>
    %9 = arith.maximumf %7, %8 : vector<16x128xf32>
    %10 = arith.addf %5, %9 : vector<16x128xf32>
    %11 = vector.shape_cast %10 : vector<16x128xf32> to vector<1x16x128xf32>
    %cst_3 = arith.constant dense<0.000000e+00> : vector<1xf32>
    %12 = vector.multi_reduction <add>, %11, %cst_3 [1, 2] : vector<1x16x128xf32> to vector<1xf32>
    %13 = vector.shape_cast %12 : vector<1xf32> to vector<1x1x1xf32>
    %14 = vector.extract %13[0, 0, 0] : f32 from vector<1x1x1xf32>
    %cst_4 = arith.constant 0.000000e+00 : f32
    %15 = arith.addf %cst_4, %14 : f32
    %cst_5 = arith.constant 4.8828125E-4 : f32
    %16 = arith.mulf %15, %cst_5 : f32
    %17 = vector.broadcast %16 : f32 to vector<1x1xf32>
    %c0_6 = arith.constant 0 : index
    %c0_7 = arith.constant 0 : index
    %18 = vector.load %arg2[%c0_6, %c0_7] : memref<1x1xf32, #tpu.memory_space<vmem>>, vector<1x1xf32>
    tpu.vector_store %arg2[%c0_6, %c0_7], %17 {strides = array<i32>} : memref<1x1xf32, #tpu.memory_space<vmem>>, vector<1x1xf32>,
    return
  }
  func.func @transform_0(%arg0: i32) -> (i32, i32) {
    %c0_i32 = arith.constant 0 : i32
    %c0_i32_0 = arith.constant 0 : i32
    %c0_i32_1 = arith.constant 0 : i32
    return %c0_i32, %c0_i32_0 : i32, i32
  }
  func.func @transform_1(%arg0: i32) -> (i32, i32) {
    %c0_i32 = arith.constant 0 : i32
    %c0_i32_0 = arith.constant 0 : i32
    %c0_i32_1 = arith.constant 0 : i32
    return %c0_i32, %c0_i32_0 : i32, i32
  }
}

</mosaic_0001>

<bundles_post_ra>
// kernel: tpu_custom_call.1
= control target key start
LH: loop header
LB: loop body
LE: loop exit
PB: predicated region body
PF: predicated region fallthrough
CT: control target
= control target key end

     0   :  { %6 = vsyncpa [#allocation3], 0  ;;  %s187_s0 = inlined_call_operand.hbm [shape: f32[16,128], index: 0, kind: input, shape index: {}]   ;;  %s188_s1 = inlined_call_operand.hbm [shape: f32[1,1], index: 1, kind: output, shape index: {}]  }
   0x1   :  { %7 = vsyncpa [#allocation4], 0  ;;  %s149_s6 = smov [#allocation2]   ;;  %s101_s10 = scalar_lea.hbm %s187_s0, 256 }
   0x2   :  { %s13_s7 = sshll.u32 %s149_s6, 4  ;;  %p102_p0 = scmp.ne.s32.totalorder %s187_s0, %s101_s10  ;;  %s14_s7 = int_to_ptr.vmem [resolvable:$true] %s13_s7 }
   0x3   :  { %p105_p1 = scmp.lt.u32.totalorder %s101_s10, %s187_s0 }
   0x5   :  { %p107_p2 = pnand %p105_p1, %p102_p0 }
   0x7   :  { %110 = shalt.err (!%p107_p2)
}
   0x8   :  { %s111_s15 = scalar_lea.vmem %s14_s7, 256  ;;  %p116_p4 = scmp.lt.s32.totalorder %s14_s7, %s14_s7 }
   0x9   :  { %p112_p3 = scmp.ne.s32.totalorder %s14_s7, %s111_s15  ;;  %p117_p5 = scmp.lt.s32.totalorder %s111_s15, %s111_s15 }
   0xb   :  { %p118_p6 = por %p117_p5, %p116_p4 }
   0xd   :  { %p119_p7 = pnand %p118_p6, %p112_p3 }
   0xf   :  { %122 = shalt.err (!%p119_p7)
}
  0x10   :  { %s150_s16 = smov 128   ;;  %s151_s17 = smov 8  }
  0x11   :  { %19 = dma.hbm_to_vmem [thread:$0]  %s187_s0, 256, %s14_s7, [#allocation3], %s150_s16, %s150_s16, %s151_s17  }
  0x12   :  { %145 = dma.done.wait [#allocation3], 256  }
  0x13   :  { %146 = vsyncadd [#allocation3], 4294967040  ;;  %v23_v0 = vld [vmem:[#allocation2] sm:$0xff]  ;;  %v24_v1 = vld [vmem:[#allocation2 + $0x8] sm:$0xff]  ;;  %s152_s0 = smov [#allocation5]   ;;  %vm70_vm2 = vcmask 0  }
  0x14   :  { %v25_v2 = vand.u32 2147483647, %v23_v0  ;;  %v26_v3 = vand.u32 2147483647, %v24_v1  ;;  %v51_v17 = vsub.f32 0.0, %v23_v0  ;;  %v52_v19 = vsub.f32 0.0, %v24_v1 }
  0x15   :  { %s78_s20 = sshll.u32 %s152_s0, 4  ;;  %s79_s20 = int_to_ptr.vmem [resolvable:$true] %s78_s20 }
  0x16   :  { %v27_v4 = vsub.f32 0.0, %v25_v2  ;;  %v28_v5 = vsub.f32 0.0, %v26_v3  ;;  %v53_v23 = vmax.f32 %v51_v17, 0.0  ;;  %v54_v26 = vmax.f32 %v52_v19, 0.0  ;;  %s123_s23 = scalar_lea.vmem %s79_s20, 16  ;;  %s127_s24 = scalar_lea.vmem %s79_s20, 32 }
  0x17   :  { %p124_p8 = scmp.ne.s32.totalorder %s79_s20, %s123_s23  ;;  %p128_p9 = scmp.lt.s32.totalorder %s79_s20, %s79_s20 }
  0x18   :  { %v29_v6 = vmul.f32 1.442695, %v27_v4  ;;  %v31_v7 = vmul.f32 1.442695, %v28_v5  ;;  %p129_p10 = scmp.lt.s32.totalorder %s127_s24, %s123_s23 }
  0x1a   :  { %93 = vpow2.f32 %v29_v6  ;;  %p130_p11 = por %p129_p10, %p128_p9 }
  0x1b   :  { %95 = vpow2.f32 %v31_v7 }
  0x1c   :  { %p131_p12 = pnand %p130_p11, %p124_p8 }
  0x24   :  { %v94_v8 = vpop.eup %93 }
  0x25   :  { %v96_v9 = vpop.eup %95  ;;  %v33_v10 = vadd.f32 1.0, %v94_v8  ;;  %v36_v12 = vmul.f32 -0.5, %v94_v8  ;;  %v39_v15 = vand.u32 2147483647, %v94_v8 }
  0x26   :  { %v42_v11 = vadd.f32 1.0, %v96_v9  ;;  %v45_v13 = vmul.f32 -0.5, %v96_v9  ;;  %v48_v18 = vand.u32 2147483647, %v96_v9 }
  0x27   :  { %97 = vlog2.f32 %v33_v10  ;;  %v37_v14 = vadd.f32 1.0, %v36_v12  ;;  %vm40_vm0 = vcmp.lt.f32.partialorder %v39_v15, 0.0004427343 }
  0x28   :  { %99 = vlog2.f32 %v42_v11  ;;  %v46_v16 = vadd.f32 1.0, %v45_v13  ;;  %vm49_vm1 = vcmp.lt.f32.partialorder %v48_v18, 0.0004427343 }
  0x29   :  { %v38_v20 = vmul.f32 %v94_v8, %v37_v14 }
  0x2a   :  { %v47_v22 = vmul.f32 %v96_v9, %v46_v16 }
  0x31   :  { %v98_v21 = vpop.eup %97 }
  0x32   :  { %v100_v24 = vpop.eup %99  ;;  %v35_v25 = vmul.f32 0.6931472, %v98_v21 }
  0x33   :  { %v44_v27 = vmul.f32 0.6931472, %v100_v24 }
  0x34   :  { %v41_v28 = vsel %vm40_vm0, %v38_v20, %v35_v25 }
  0x35   :  { %v50_v29 = vsel %vm49_vm1, %v47_v22, %v44_v27  ;;  %v55_v30 = vadd.f32 %v53_v23, %v41_v28 }
  0x36   :  { %v56_v31 = vadd.f32 %v54_v26, %v50_v29 }
  0x38   :  { %v57_v32 = vadd.f32 %v56_v31, %v55_v30 }
  0x3a   :  { %58 = vadd.xlane.f32.xlu0 %v57_v32 }
  0xc7   :  { %v59_v33 = vpop.xlane.xlu0 %58 }
  0xc8   :  { %v60_v34 = vrot.slane %v59_v33, 4 }
  0xca   :  { %v61_v35 = vadd.f32 %v60_v34, %v59_v33 }
  0xcc   :  { %v62_v36 = vrot.slane %v61_v35, 2 }
  0xce   :  { %v63_v37 = vadd.f32 %v62_v36, %v61_v35 }
  0xd0   :  { %v64_v38 = vrot.slane %v63_v37, 1 }
  0xd2   :  { %v65_v39 = vadd.f32 %v64_v38, %v63_v37 }
  0xd4   :  { %87 = vpush %v65_v39 }
 0x105   :  { %s88_s21 = spop %87 }
 0x106   :  { %s68_s22 = smul.f32 0.00048828125, %s88_s21 }
 0x108   :  { %v69_v40 = vstv %s68_s22 }
 0x109   :  { %71 = vst.msk [vmem:[#allocation5] sm:$0x1] %vm70_vm2, %v69_v40 }
 0x10a   :  { %134 = shalt.err (!%p131_p12)
}
 0x10b   :  { %s135_s27 = scalar_lea.hbm %s188_s1, 16 }
 0x10c   :  { %p136_p13 = scmp.ne.s32.totalorder %s188_s1, %s135_s27  ;;  %p139_p0 = scmp.lt.u32.totalorder %s135_s27, %s188_s1 }
 0x10e   :  { %p141_p1 = pnand %p139_p0, %p136_p13 }
 0x110   :  { %144 = shalt.err (!%p141_p1)
}
 0x111   :  { %81 = dma.vmem_to_hbm [thread:$0]  %s79_s20, 16, %s188_s1, [#allocation4]  }
 0x112   :  { %147 = dma.done.wait [#allocation4], 16  }
 0x113   :  { %148 = vsyncadd [#allocation4], 4294967280 }
 0x114   :  { %85 = vsyncpa [#allocation3], 1 }
 0x115   :  { %86 = vsyncpa [#allocation4], 1 }

</bundles_post_ra>
